<compile_context>
chip_gen: v7x
topology: tpu7x:2x2x1
jax: 0.10.0
libtpu: 0.0.40
codegen_flags: <defaults>
</compile_context>

<pallas_src>
import functools

import jax
import jax.numpy as jnp
from jax.experimental import pallas as pl
from jax.experimental.pallas import tpu as pltpu

_LEAKY_SLOPE = 0.01   # nn.LeakyReLU default
_LANE = 128
_SUBLANE = 8


def _round_up(x, m):
    return (x + m - 1) // m * m


def _vmem_capacity_bytes():
    try:
        return int(pltpu.get_tpu_info().vmem_capacity_bytes)
    except Exception:
        return 64 << 20   # conservative: v7x per-TensorCore VMEM


def _decoder_kernel(n_layers, x_ref, *rest):
    """rest = (w1, b1, w2, b2, ..., wn, bn, out_ref).

    Weights are pre-transposed/padded to (in_p, out_p) in bf16; biases are (1, out_p) f32.
    The whole MLP chain is fused; padded lanes stay exactly zero (zero weight rows/cols,
    zero bias, LeakyReLU(0) == 0).
    """
    out_ref = rest[-1]
    h = x_ref[...].astype(jnp.float32)                    # (TB, in_p)
    for l in range(n_layers):
        w = rest[2 * l][...]                              # (in_p, out_p) bf16
        b = rest[2 * l + 1][...]                          # (1, out_p) f32 — implicit broadcast
        h = jnp.dot(h.astype(w.dtype), w,
                    preferred_element_type=jnp.float32) + b
        if l < n_layers - 1:                              # last layer: no activation
            h = jnp.maximum(h, _LEAKY_SLOPE * h)          # LeakyReLU (slope < 1)
    out_ref[...] = h.astype(out_ref.dtype)


def pack_decoder_params(raw_params, *, weight_dtype=jnp.bfloat16):
    """One-time packing: PyTorch (out, in) weights -> padded (in_p, out_p) bf16; bias -> (1, out_p) f32."""
    packed = []
    for w, b in raw_params:
        out_f, in_f = w.shape
        in_p = _round_up(in_f, _LANE)
        out_p = _round_up(out_f, _LANE)
        wt = jnp.zeros((in_p, out_p), weight_dtype).at[:in_f, :out_f].set(
            w.T.astype(weight_dtype))
        bp = jnp.zeros((1, out_p), jnp.float32).at[0, :out_f].set(b.astype(jnp.float32))
        packed.append((wt, bp))
    return packed


def _pallas_decoder_call(x_p, packed_params, TB, B_pad, in_p, out_p,
                         vmem_limit, single_buffer_weights):
    n_layers = len(packed_params)
    flat_params = []
    in_specs = [pl.BlockSpec((TB, in_p), lambda i: (i, 0))]
    for wt, bp in packed_params:
        flat_params += [wt, bp]
        if single_buffer_weights:
            # Resident params: constant index_map + single buffer (no useless 2nd copy).
            in_specs.append(pl.BlockSpec(wt.shape, lambda i: (0, 0),
                                         pipeline_mode=pl.Buffered(1)))
            in_specs.append(pl.BlockSpec(bp.shape, lambda i: (0, 0),
                                         pipeline_mode=pl.Buffered(1)))
        else:
            in_specs.append(pl.BlockSpec(wt.shape, lambda i: (0, 0)))
            in_specs.append(pl.BlockSpec(bp.shape, lambda i: (0, 0)))
    out_spec = pl.BlockSpec((TB, out_p), lambda i: (i, 0))

    return pl.pallas_call(
        functools.partial(_decoder_kernel, n_layers),
        out_shape=jax.ShapeDtypeStruct((B_pad, out_p), x_p.dtype),
        grid_spec=pltpu.PrefetchScalarGridSpec(
            num_scalar_prefetch=0,
            grid=(B_pad // TB,),
            in_specs=in_specs,
            out_specs=out_spec,
        ),
        compiler_params=pltpu.CompilerParams(
            dimension_semantics=("parallel",),
            vmem_limit_bytes=int(vmem_limit),
        ),
    )(x_p, *flat_params)


def decoder_forward(x, packed_params, n_features, *, tb=None):
    """x: (B, size_z) float32. packed_params from pack_decoder_params."""
    B, size_z = x.shape
    in_p = packed_params[0][0].shape[0]
    out_p = packed_params[-1][0].shape[1]

    vmem_cap = _vmem_capacity_bytes()
    if tb is None:
        # Smaller batch tiles where VMEM is small (v7x: 64 MiB/TC), bigger on v5e/v6e.
        tb = 256 if vmem_cap <= (64 << 20) else 512

    # Batch tile: multiple of 8 (sublane), and >= 2 grid steps whenever the batch allows
    # it so the "parallel" axis shards across v7x TensorCores and the x/out DMA pipelines.
    B_ceil = _round_up(B, _SUBLANE)
    TB = min(B_ceil, _round_up(tb, _SUBLANE))
    if B_ceil // TB < 2 and B_ceil >= 2 * _SUBLANE:
        TB = _round_up(pl.cdiv(B_ceil, 2), _SUBLANE)
    B_pad = _round_up(B, TB)

    # Zero-pad input batch / feature lanes only when needed (padding contributes zero).
    if B_pad == B and size_z == in_p:
        x_p = x
    else:
        x_p = jnp.zeros((B_pad, in_p), x.dtype).at[:B, :size_z].set(x)

    # VMEM budget: double-buffered x/out tiles + resident params + f32 intermediates.
    itemsize = jnp.dtype(x.dtype).itemsize
    weight_bytes = sum(w.size * w.dtype.itemsize + b.size * b.dtype.itemsize
                       for w, b in packed_params)
    widest = max([in_p, out_p] + [w.shape[1] for w, _ in packed_params])
    io_bytes = 2 * TB * (in_p + out_p) * itemsize          # double-buffered I/O tiles
    inter_bytes = 3 * TB * widest * 4                      # f32 intermediates headroom
    vmem_ceiling = int(0.85 * vmem_cap)                    # leave headroom for Mosaic scratch

    def _limit(weight_buffers):
        need = weight_buffers * weight_bytes + io_bytes + inter_bytes + (2 << 20)
        return int(min(max(need, 32 << 20), vmem_ceiling))

    # TODO(synk): if the (bf16) weight stack does not fit resident in VMEM (very wide
    # hidden layers), add an output(N)-tiled second grid axis or stream the widest
    # layer's weight with pltpu.emit_pipeline instead of assuming full residency.

    out_padded = None
    if hasattr(pl, "Buffered"):
        try:
            out_padded = _pallas_decoder_call(
                x_p, packed_params, TB, B_pad, in_p, out_p, _limit(1), True)
        except Exception:
            out_padded = None
    if out_padded is None:
        out_padded = _pallas_decoder_call(
            x_p, packed_params, TB, B_pad, in_p, out_p, _limit(2), False)

    return out_padded[:B, :n_features]


def init_decoder_params(key, size_z, n_features, n_hidden_features):
    """PyTorch nn.Linear-style init (U[-1/sqrt(in), 1/sqrt(in)]) for the decoder stack."""
    dims = [size_z] + list(reversed(n_hidden_features)) + [n_features]
    keys = jax.random.split(key, 2 * (len(dims) - 1))
    raw = []
    for l in range(len(dims) - 1):
        in_f, out_f = dims[l], dims[l + 1]
        bound = 1.0 / (in_f ** 0.5)
        w = jax.random.uniform(keys[2 * l], (out_f, in_f), jnp.float32, -bound, bound)
        b = jax.random.uniform(keys[2 * l + 1], (out_f,), jnp.float32, -bound, bound)
        raw.append((w, b))
    return raw


if __name__ == "__main__":
    # Small shapes: Decoder(size_z=8, n_features=64, n_hidden_features=[32, 16], bias=True)
    # -> layers: 8 -> 16 -> 32 -> 64 (LeakyReLU between, none on the last).
    B, size_z, n_features = 8, 8, 64
    n_hidden_features = [32, 16]

    key = jax.random.PRNGKey(0)
    k_x, k_p = jax.random.split(key)
    x = jax.random.normal(k_x, (B, size_z), jnp.float32)

    raw_params = init_decoder_params(k_p, size_z, n_features, n_hidden_features)
    packed = pack_decoder_params(raw_params)   # one-time transpose + pad + bf16 cast

    out = decoder_forward(x, packed, n_features)
    out = jax.block_until_ready(out)

    # Reference 1: exact emulation of the kernel math (bf16 inputs/weights, f32 accumulate).
    h = x
    for l, (w, b) in enumerate(raw_params):
        wt = w.T.astype(jnp.bfloat16).astype(jnp.float32)
        h = jnp.dot(h.astype(jnp.bfloat16).astype(jnp.float32), wt,
                    precision=jax.lax.Precision.HIGHEST) + b
        if l < len(raw_params) - 1:
            h = jnp.maximum(h, _LEAKY_SLOPE * h)
    ref_bf16 = h

    # Reference 2: full-f32 PyTorch-equivalent math (loose check covering bf16 weight error).
    h = x
    for l, (w, b) in enumerate(raw_params):
        h = jnp.dot(h, w.T, precision=jax.lax.Precision.HIGHEST) + b
        if l < len(raw_params) - 1:
            h = jnp.where(h > 0, h, _LEAKY_SLOPE * h)
    ref_f32 = h

    assert out.shape == (B, n_features)
    assert jnp.allclose(out, ref_bf16, atol=2e-3, rtol=2e-3), \
        float(jnp.max(jnp.abs(out - ref_bf16)))
    assert jnp.allclose(out, ref_f32, atol=5e-2, rtol=5e-2), \
        float(jnp.max(jnp.abs(out - ref_f32)))
    print("KERNEL_OK")
</pallas_src>

<mosaic_0001>
module attributes {stable_mosaic.version = 11 : i64} {
  func.func @_decoder_kernel(%arg0: i32, %arg1: memref<8x128xf32, #tpu.memory_space<vmem>>, %arg2: memref<128x128xbf16, #tpu.memory_space<vmem>>, %arg3: memref<1x128xf32, #tpu.memory_space<vmem>>, %arg4: memref<128x128xbf16, #tpu.memory_space<vmem>>, %arg5: memref<1x128xf32, #tpu.memory_space<vmem>>, %arg6: memref<128x128xbf16, #tpu.memory_space<vmem>>, %arg7: memref<1x128xf32, #tpu.memory_space<vmem>>, %arg8: memref<8x128xf32, #tpu.memory_space<vmem>>) attributes {dimension_semantics = [#tpu.dimension_semantics<parallel>], iteration_bounds = array<i64: 1>, scalar_prefetch = 0 : i64, scratch_operands = 0 : i64, tpu.core_type = #tpu.core_type<tc>, window_params = [{transform_indices = @transform_0, window_bounds = array<i64: 8, 128>}, {pipeline_mode = #tpu.pipeline_mode<synchronous>, transform_indices = @transform_1, window_bounds = array<i64: 128, 128>}, {pipeline_mode = #tpu.pipeline_mode<synchronous>, transform_indices = @transform_2, window_bounds = array<i64: 1, 128>}, {pipeline_mode = #tpu.pipeline_mode<synchronous>, transform_indices = @transform_3, window_bounds = array<i64: 128, 128>}, {pipeline_mode = #tpu.pipeline_mode<synchronous>, transform_indices = @transform_4, window_bounds = array<i64: 1, 128>}, {pipeline_mode = #tpu.pipeline_mode<synchronous>, transform_indices = @transform_5, window_bounds = array<i64: 128, 128>}, {pipeline_mode = #tpu.pipeline_mode<synchronous>, transform_indices = @transform_6, window_bounds = array<i64: 1, 128>}, {transform_indices = @transform_7, window_bounds = array<i64: 8, 128>}]} {
    %c0 = arith.constant 0 : index
    %c0_0 = arith.constant 0 : index
    %0 = vector.load %arg1[%c0, %c0_0] : memref<8x128xf32, #tpu.memory_space<vmem>>, vector<8x128xf32>
    %c0_1 = arith.constant 0 : index
    %c0_2 = arith.constant 0 : index
    %1 = vector.load %arg2[%c0_1, %c0_2] : memref<128x128xbf16, #tpu.memory_space<vmem>>, vector<128x128xbf16>
    %c0_3 = arith.constant 0 : index
    %c0_4 = arith.constant 0 : index
    %2 = vector.load %arg3[%c0_3, %c0_4] : memref<1x128xf32, #tpu.memory_space<vmem>>, vector<1x128xf32>
    %3 = arith.truncf %0 : vector<8x128xf32> to vector<8x128xbf16>
    %cst = arith.constant dense<0.000000e+00> : vector<8x128xf32>
    %4 = tpu.matmul %3, %1, %cst {dimension_numbers = #tpu.dot_dimension_numbers<[1], [0], [0], [1], [0, 0, 1, 1], [], []>} : vector<8x128xbf16>, vector<128x128xbf16>, vector<8x128xf32> -> vector<8x128xf32>
    %5 = vector.broadcast %2 : vector<1x128xf32> to vector<8x128xf32>
    %6 = arith.addf %4, %5 : vector<8x128xf32>
    %cst_5 = arith.constant 0.00999999977 : f32
    %7 = vector.broadcast %cst_5 : f32 to vector<8x128xf32>
    %8 = arith.mulf %7, %6 : vector<8x128xf32>
    %9 = arith.maximumf %6, %8 : vector<8x128xf32>
    %c0_6 = arith.constant 0 : index
    %c0_7 = arith.constant 0 : index
    %10 = vector.load %arg4[%c0_6, %c0_7] : memref<128x128xbf16, #tpu.memory_space<vmem>>, vector<128x128xbf16>
    %c0_8 = arith.constant 0 : index
    %c0_9 = arith.constant 0 : index
    %11 = vector.load %arg5[%c0_8, %c0_9] : memref<1x128xf32, #tpu.memory_space<vmem>>, vector<1x128xf32>
    %12 = arith.truncf %9 : vector<8x128xf32> to vector<8x128xbf16>
    %cst_10 = arith.constant dense<0.000000e+00> : vector<8x128xf32>
    %13 = tpu.matmul %12, %10, %cst_10 {dimension_numbers = #tpu.dot_dimension_numbers<[1], [0], [0], [1], [0, 0, 1, 1], [], []>} : vector<8x128xbf16>, vector<128x128xbf16>, vector<8x128xf32> -> vector<8x128xf32>
    %14 = vector.broadcast %11 : vector<1x128xf32> to vector<8x128xf32>
    %15 = arith.addf %13, %14 : vector<8x128xf32>
    %cst_11 = arith.constant 0.00999999977 : f32
    %16 = vector.broadcast %cst_11 : f32 to vector<8x128xf32>
    %17 = arith.mulf %16, %15 : vector<8x128xf32>
    %18 = arith.maximumf %15, %17 : vector<8x128xf32>
    %c0_12 = arith.constant 0 : index
    %c0_13 = arith.constant 0 : index
    %19 = vector.load %arg6[%c0_12, %c0_13] : memref<128x128xbf16, #tpu.memory_space<vmem>>, vector<128x128xbf16>
    %c0_14 = arith.constant 0 : index
    %c0_15 = arith.constant 0 : index
    %20 = vector.load %arg7[%c0_14, %c0_15] : memref<1x128xf32, #tpu.memory_space<vmem>>, vector<1x128xf32>
    %21 = arith.truncf %18 : vector<8x128xf32> to vector<8x128xbf16>
    %cst_16 = arith.constant dense<0.000000e+00> : vector<8x128xf32>
    %22 = tpu.matmul %21, %19, %cst_16 {dimension_numbers = #tpu.dot_dimension_numbers<[1], [0], [0], [1], [0, 0, 1, 1], [], []>} : vector<8x128xbf16>, vector<128x128xbf16>, vector<8x128xf32> -> vector<8x128xf32>
    %23 = vector.broadcast %20 : vector<1x128xf32> to vector<8x128xf32>
    %24 = arith.addf %22, %23 : vector<8x128xf32>
    %c0_17 = arith.constant 0 : index
    %c0_18 = arith.constant 0 : index
    %25 = vector.load %arg8[%c0_17, %c0_18] : memref<8x128xf32, #tpu.memory_space<vmem>>, vector<8x128xf32>
    tpu.vector_store %arg8[%c0_17, %c0_18], %24 {strides = array<i32>} : memref<8x128xf32, #tpu.memory_space<vmem>>, vector<8x128xf32>,
    return
  }
  func.func @transform_0(%arg0: i32) -> (i32, i32) {
    %c0_i32 = arith.constant 0 : i32
    %c0_i32_0 = arith.constant 0 : i32
    return %arg0, %c0_i32 : i32, i32
  }
  func.func @transform_1(%arg0: i32) -> (i32, i32) {
    %c0_i32 = arith.constant 0 : i32
    %c0_i32_0 = arith.constant 0 : i32
    %c0_i32_1 = arith.constant 0 : i32
    return %c0_i32, %c0_i32_0 : i32, i32
  }
  func.func @transform_2(%arg0: i32) -> (i32, i32) {
    %c0_i32 = arith.constant 0 : i32
    %c0_i32_0 = arith.constant 0 : i32
    %c0_i32_1 = arith.constant 0 : i32
    return %c0_i32, %c0_i32_0 : i32, i32
  }
  func.func @transform_3(%arg0: i32) -> (i32, i32) {
    %c0_i32 = arith.constant 0 : i32
    %c0_i32_0 = arith.constant 0 : i32
    %c0_i32_1 = arith.constant 0 : i32
    return %c0_i32, %c0_i32_0 : i32, i32
  }
  func.func @transform_4(%arg0: i32) -> (i32, i32) {
    %c0_i32 = arith.constant 0 : i32
    %c0_i32_0 = arith.constant 0 : i32
    %c0_i32_1 = arith.constant 0 : i32
    return %c0_i32, %c0_i32_0 : i32, i32
  }
  func.func @transform_5(%arg0: i32) -> (i32, i32) {
    %c0_i32 = arith.constant 0 : i32
    %c0_i32_0 = arith.constant 0 : i32
    %c0_i32_1 = arith.constant 0 : i32
    return %c0_i32, %c0_i32_0 : i32, i32
  }
  func.func @transform_6(%arg0: i32) -> (i32, i32) {
    %c0_i32 = arith.constant 0 : i32
    %c0_i32_0 = arith.constant 0 : i32
    %c0_i32_1 = arith.constant 0 : i32
    return %c0_i32, %c0_i32_0 : i32, i32
  }
  func.func @transform_7(%arg0: i32) -> (i32, i32) {
    %c0_i32 = arith.constant 0 : i32
    %c0_i32_0 = arith.constant 0 : i32
    return %arg0, %c0_i32 : i32, i32
  }
}

module attributes {stable_mosaic.version = 11 : i64} {
  func.func @_decoder_kernel(%arg0: i32, %arg1: memref<8x128xf32, #tpu.memory_space<vmem>>, %arg2: memref<128x128xbf16, #tpu.memory_space<vmem>>, %arg3: memref<1x128xf32, #tpu.memory_space<vmem>>, %arg4: memref<128x128xbf16, #tpu.memory_space<vmem>>, %arg5: memref<1x128xf32, #tpu.memory_space<vmem>>, %arg6: memref<128x128xbf16, #tpu.memory_space<vmem>>, %arg7: memref<1x128xf32, #tpu.memory_space<vmem>>, %arg8: memref<8x128xf32, #tpu.memory_space<vmem>>) attributes {dimension_semantics = [#tpu.dimension_semantics<parallel>], iteration_bounds = array<i64: 1>, scalar_prefetch = 0 : i64, scratch_operands = 0 : i64, tpu.core_type = #tpu.core_type<tc>, window_params = [{transform_indices = @transform_0, window_bounds = array<i64: 8, 128>}, {pipeline_mode = #tpu.pipeline_mode<synchronous>, transform_indices = @transform_1, window_bounds = array<i64: 128, 128>}, {pipeline_mode = #tpu.pipeline_mode<synchronous>, transform_indices = @transform_2, window_bounds = array<i64: 1, 128>}, {pipeline_mode = #tpu.pipeline_mode<synchronous>, transform_indices = @transform_3, window_bounds = array<i64: 128, 128>}, {pipeline_mode = #tpu.pipeline_mode<synchronous>, transform_indices = @transform_4, window_bounds = array<i64: 1, 128>}, {pipeline_mode = #tpu.pipeline_mode<synchronous>, transform_indices = @transform_5, window_bounds = array<i64: 128, 128>}, {pipeline_mode = #tpu.pipeline_mode<synchronous>, transform_indices = @transform_6, window_bounds = array<i64: 1, 128>}, {transform_indices = @transform_7, window_bounds = array<i64: 8, 128>}]} {
    %c0 = arith.constant 0 : index
    %c0_0 = arith.constant 0 : index
    %0 = vector.load %arg1[%c0, %c0_0] : memref<8x128xf32, #tpu.memory_space<vmem>>, vector<8x128xf32>
    %c0_1 = arith.constant 0 : index
    %c0_2 = arith.constant 0 : index
    %1 = vector.load %arg2[%c0_1, %c0_2] : memref<128x128xbf16, #tpu.memory_space<vmem>>, vector<128x128xbf16>
    %c0_3 = arith.constant 0 : index
    %c0_4 = arith.constant 0 : index
    %2 = vector.load %arg3[%c0_3, %c0_4] : memref<1x128xf32, #tpu.memory_space<vmem>>, vector<1x128xf32>
    %3 = arith.truncf %0 : vector<8x128xf32> to vector<8x128xbf16>
    %cst = arith.constant dense<0.000000e+00> : vector<8x128xf32>
    %4 = tpu.matmul %3, %1, %cst {dimension_numbers = #tpu.dot_dimension_numbers<[1], [0], [0], [1], [0, 0, 1, 1], [], []>} : vector<8x128xbf16>, vector<128x128xbf16>, vector<8x128xf32> -> vector<8x128xf32>
    %5 = vector.broadcast %2 : vector<1x128xf32> to vector<8x128xf32>
    %6 = arith.addf %4, %5 : vector<8x128xf32>
    %cst_5 = arith.constant 0.00999999977 : f32
    %7 = vector.broadcast %cst_5 : f32 to vector<8x128xf32>
    %8 = arith.mulf %7, %6 : vector<8x128xf32>
    %9 = arith.maximumf %6, %8 : vector<8x128xf32>
    %c0_6 = arith.constant 0 : index
    %c0_7 = arith.constant 0 : index
    %10 = vector.load %arg4[%c0_6, %c0_7] : memref<128x128xbf16, #tpu.memory_space<vmem>>, vector<128x128xbf16>
    %c0_8 = arith.constant 0 : index
    %c0_9 = arith.constant 0 : index
    %11 = vector.load %arg5[%c0_8, %c0_9] : memref<1x128xf32, #tpu.memory_space<vmem>>, vector<1x128xf32>
    %12 = arith.truncf %9 : vector<8x128xf32> to vector<8x128xbf16>
    %cst_10 = arith.constant dense<0.000000e+00> : vector<8x128xf32>
    %13 = tpu.matmul %12, %10, %cst_10 {dimension_numbers = #tpu.dot_dimension_numbers<[1], [0], [0], [1], [0, 0, 1, 1], [], []>} : vector<8x128xbf16>, vector<128x128xbf16>, vector<8x128xf32> -> vector<8x128xf32>
    %14 = vector.broadcast %11 : vector<1x128xf32> to vector<8x128xf32>
    %15 = arith.addf %13, %14 : vector<8x128xf32>
    %cst_11 = arith.constant 0.00999999977 : f32
    %16 = vector.broadcast %cst_11 : f32 to vector<8x128xf32>
    %17 = arith.mulf %16, %15 : vector<8x128xf32>
    %18 = arith.maximumf %15, %17 : vector<8x128xf32>
    %c0_12 = arith.constant 0 : index
    %c0_13 = arith.constant 0 : index
    %19 = vector.load %arg6[%c0_12, %c0_13] : memref<128x128xbf16, #tpu.memory_space<vmem>>, vector<128x128xbf16>
    %c0_14 = arith.constant 0 : index
    %c0_15 = arith.constant 0 : index
    %20 = vector.load %arg7[%c0_14, %c0_15] : memref<1x128xf32, #tpu.memory_space<vmem>>, vector<1x128xf32>
    %21 = arith.truncf %18 : vector<8x128xf32> to vector<8x128xbf16>
    %cst_16 = arith.constant dense<0.000000e+00> : vector<8x128xf32>
    %22 = tpu.matmul %21, %19, %cst_16 {dimension_numbers = #tpu.dot_dimension_numbers<[1], [0], [0], [1], [0, 0, 1, 1], [], []>} : vector<8x128xbf16>, vector<128x128xbf16>, vector<8x128xf32> -> vector<8x128xf32>
    %23 = vector.broadcast %20 : vector<1x128xf32> to vector<8x128xf32>
    %24 = arith.addf %22, %23 : vector<8x128xf32>
    %c0_17 = arith.constant 0 : index
    %c0_18 = arith.constant 0 : index
    %25 = vector.load %arg8[%c0_17, %c0_18] : memref<8x128xf32, #tpu.memory_space<vmem>>, vector<8x128xf32>
    tpu.vector_store %arg8[%c0_17, %c0_18], %24 {strides = array<i32>} : memref<8x128xf32, #tpu.memory_space<vmem>>, vector<8x128xf32>,
    return
  }
  func.func @transform_0(%arg0: i32) -> (i32, i32) {
    %c0_i32 = arith.constant 0 : i32
    %c0_i32_0 = arith.constant 0 : i32
    return %arg0, %c0_i32 : i32, i32
  }
  func.func @transform_1(%arg0: i32) -> (i32, i32) {
    %c0_i32 = arith.constant 0 : i32
    %c0_i32_0 = arith.constant 0 : i32
    %c0_i32_1 = arith.constant 0 : i32
    return %c0_i32, %c0_i32_0 : i32, i32
  }
  func.func @transform_2(%arg0: i32) -> (i32, i32) {
    %c0_i32 = arith.constant 0 : i32
    %c0_i32_0 = arith.constant 0 : i32
    %c0_i32_1 = arith.constant 0 : i32
    return %c0_i32, %c0_i32_0 : i32, i32
  }
  func.func @transform_3(%arg0: i32) -> (i32, i32) {
    %c0_i32 = arith.constant 0 : i32
    %c0_i32_0 = arith.constant 0 : i32
    %c0_i32_1 = arith.constant 0 : i32
    return %c0_i32, %c0_i32_0 : i32, i32
  }
  func.func @transform_4(%arg0: i32) -> (i32, i32) {
    %c0_i32 = arith.constant 0 : i32
    %c0_i32_0 = arith.constant 0 : i32
    %c0_i32_1 = arith.constant 0 : i32
    return %c0_i32, %c0_i32_0 : i32, i32
  }
  func.func @transform_5(%arg0: i32) -> (i32, i32) {
    %c0_i32 = arith.constant 0 : i32
    %c0_i32_0 = arith.constant 0 : i32
    %c0_i32_1 = arith.constant 0 : i32
    return %c0_i32, %c0_i32_0 : i32, i32
  }
  func.func @transform_6(%arg0: i32) -> (i32, i32) {
    %c0_i32 = arith.constant 0 : i32
    %c0_i32_0 = arith.constant 0 : i32
    %c0_i32_1 = arith.constant 0 : i32
    return %c0_i32, %c0_i32_0 : i32, i32
  }
  func.func @transform_7(%arg0: i32) -> (i32, i32) {
    %c0_i32 = arith.constant 0 : i32
    %c0_i32_0 = arith.constant 0 : i32
    return %arg0, %c0_i32 : i32, i32
  }
}

</mosaic_0001>

<bundles_post_ra>
// kernel: tpu_custom_call.1
= control target key start
LH: loop header
LB: loop body
LE: loop exit
PB: predicated region body
PF: predicated region fallthrough
CT: control target
= control target key end

     0   :  { %12 = vsyncpa [#allocation3], 0  ;;  %s862_s0 = inlined_call_operand.hbm [shape: f32[8,128], index: 0, kind: input, shape index: {}]   ;;  %s863_s1 = inlined_call_operand.hbm [shape: bf16[128,128], index: 1, kind: input, shape index: {}]   ;;  %s864_s2 = inlined_call_operand.vmem [shape: f32[1,128], index: 2, kind: input, shape index: {}]   ;;  %s865_s3 = inlined_call_operand.hbm [shape: bf16[128,128], index: 3, kind: input, shape index: {}]   ;;  %s866_s4 = inlined_call_operand.vmem [shape: f32[1,128], index: 4, kind: input, shape index: {}]   ;;  %s867_s5 = inlined_call_operand.hbm [shape: bf16[128,128], index: 5, kind: input, shape index: {}]   ;;  %s868_s6 = inlined_call_operand.vmem [shape: f32[1,128], index: 6, kind: input, shape index: {}]   ;;  %s869_s7 = inlined_call_operand.hbm [shape: f32[8,128], index: 7, kind: output, shape index: {}]  }
   0x1   :  { %13 = vsyncpa [#allocation6], 0 }
   0x2   :  { %14 = vsyncpa [#allocation9], 0 }
   0x3   :  { %15 = vsyncpa [#allocation4], 0  ;;  %s705_s24 = smov [#allocation5]   ;;  %s587_s28 = scalar_lea.hbm %s863_s1, 1024 }
   0x4   :  { %s31_s25 = sshll.u32 %s705_s24, 4  ;;  %p588_p0 = scmp.ne.s32.totalorder %s863_s1, %s587_s28  ;;  %s32_s25 = int_to_ptr.vmem [resolvable:$true] %s31_s25 }
   0x5   :  { %p591_p1 = scmp.lt.u32.totalorder %s587_s28, %s863_s1 }
   0x7   :  { %p593_p2 = pnand %p591_p1, %p588_p0 }
   0x9   :  { %596 = shalt.err (!%p593_p2)
}
   0xa   :  { %s597_s10 = scalar_lea.vmem %s32_s25, 1024  ;;  %p602_p4 = scmp.lt.s32.totalorder %s32_s25, %s32_s25 }
   0xb   :  { %p598_p3 = scmp.ne.s32.totalorder %s32_s25, %s597_s10  ;;  %p603_p5 = scmp.lt.s32.totalorder %s597_s10, %s597_s10 }
   0xd   :  { %p604_p6 = por %p603_p5, %p602_p4 }
   0xf   :  { %p605_p7 = pnand %p604_p6, %p598_p3 }
  0x11   :  { %608 = shalt.err (!%p605_p7)
}
  0x12   :  { %s706_s11 = smov 64   ;;  %s707_s12 = smov 4  }
  0x13   :  { %37 = dma.hbm_to_vmem [thread:$0]  %s863_s1, 1024, %s32_s25, [#allocation6], %s706_s11, %s706_s11, %s707_s12  }
  0x14   :  { %s708_s15 = smov [#allocation2]   ;;  %s709_s17 = smov [#allocation7]  }
  0x15   :  { %s22_s16 = sshll.u32 %s708_s15, 4  ;;  %s45_s18 = sshll.u32 %s709_s17, 4  ;;  %s23_s16 = int_to_ptr.vmem [resolvable:$true] %s22_s16  ;;  %s46_s18 = int_to_ptr.vmem [resolvable:$true] %s45_s18 }
  0x16   :  { %s609_s21 = scalar_lea.hbm %s862_s0, 128 }
  0x17   :  { %p610_p8 = scmp.ne.s32.totalorder %s862_s0, %s609_s21  ;;  %p613_p9 = scmp.lt.u32.totalorder %s609_s21, %s862_s0 }
  0x19   :  { %p615_p10 = pnand %p613_p9, %p610_p8 }
  0x1b   :  { %618 = shalt.err (!%p615_p10)
}
  0x1c   :  { %s619_s1 = scalar_lea.vmem %s23_s16, 128  ;;  %p624_p12 = scmp.lt.s32.totalorder %s23_s16, %s23_s16 }
  0x1d   :  { %p620_p11 = scmp.ne.s32.totalorder %s23_s16, %s619_s1  ;;  %p625_p13 = scmp.lt.s32.totalorder %s619_s1, %s619_s1 }
  0x1f   :  { %p626_p0 = por %p625_p13, %p624_p12 }
  0x21   :  { %p627_p1 = pnand %p626_p0, %p620_p11 }
  0x23   :  { %630 = shalt.err (!%p627_p1)
}
  0x24   :  { %25 = dma.hbm_to_vmem [thread:$0]  %s862_s0, 128, %s23_s16, [#allocation3]  }
  0x25   :  { %s631_s30 = scalar_lea.hbm %s865_s3, 1024 }
  0x26   :  { %p632_p2 = scmp.ne.s32.totalorder %s865_s3, %s631_s30  ;;  %p635_p3 = scmp.lt.u32.totalorder %s631_s30, %s865_s3 }
  0x28   :  { %p637_p4 = pnand %p635_p3, %p632_p2 }
  0x2a   :  { %640 = shalt.err (!%p637_p4)
}
  0x2b   :  { %s641_s14 = scalar_lea.vmem %s46_s18, 1024  ;;  %p646_p6 = scmp.lt.s32.totalorder %s46_s18, %s46_s18 }
  0x2c   :  { %p642_p5 = scmp.ne.s32.totalorder %s46_s18, %s641_s14  ;;  %p647_p7 = scmp.lt.s32.totalorder %s641_s14, %s641_s14 }
  0x2e   :  { %p648_p8 = por %p647_p7, %p646_p6 }
  0x30   :  { %p649_p9 = pnand %p648_p8, %p642_p5 }
  0x32   :  { %652 = shalt.err (!%p649_p9)
}
  0x33   :  { %51 = dma.hbm_to_vmem [thread:$0]  %s865_s3, 1024, %s46_s18, [#allocation6], %s706_s11, %s706_s11, %s707_s12  }
  0x34   :  { %s710_s16 = smov [#allocation8]   ;;  %s653_s21 = scalar_lea.hbm %s867_s5, 1024 }
  0x35   :  { %s59_s17 = sshll.u32 %s710_s16, 4  ;;  %p654_p10 = scmp.ne.s32.totalorder %s867_s5, %s653_s21  ;;  %s60_s17 = int_to_ptr.vmem [resolvable:$true] %s59_s17 }
  0x36   :  { %p657_p11 = scmp.lt.u32.totalorder %s653_s21, %s867_s5 }
  0x38   :  { %p659_p12 = pnand %p657_p11, %p654_p10 }
  0x3a   :  { %662 = shalt.err (!%p659_p12)
}
  0x3b   :  { %s663_s1 = scalar_lea.vmem %s60_s17, 1024  ;;  %p668_p0 = scmp.lt.s32.totalorder %s60_s17, %s60_s17 }
  0x3c   :  { %p664_p13 = scmp.ne.s32.totalorder %s60_s17, %s663_s1  ;;  %p669_p1 = scmp.lt.s32.totalorder %s663_s1, %s663_s1 }
  0x3e   :  { %p670_p2 = por %p669_p1, %p668_p0 }
  0x40   :  { %p671_p3 = pnand %p670_p2, %p664_p13 }
  0x42   :  { %674 = shalt.err (!%p671_p3)
}
  0x43   :  { %65 = dma.hbm_to_vmem [thread:$0]  %s867_s5, 1024, %s60_s17, [#allocation9], %s706_s11, %s706_s11, %s707_s12  }
  0x44   :  { %697 = dma.done.wait [#allocation3], 128  }
  0x45   :  { %698 = vsyncadd [#allocation3], 4294967168 }
  0x46   :  { %699 = dma.done.wait [#allocation6], 2048  }
  0x47   :  { %700 = vsyncadd [#allocation6], 4294965248 }
  0x48   :  { %701 = dma.done.wait [#allocation9], 1024  }
  0x49   :  { %702 = vsyncadd [#allocation9], 4294966272  ;;  %v711_v0 = vmov 0.0   ;;  %vm712_vm0 = vmmov 0   ;;  %v563_v1 = vld [vmem:[#allocation5] sm:$0xff]   ;;  %v564_v2 = vld [vmem:[#allocation5 + $0x8] sm:$0xff]  }
  0x4a   :  { %494 = vmatprep.subr.bf16.mxu0 %v711_v0  ;;  %510 = vmatprep.mubr.msk.bf16.mxu0 %vm712_vm0, %v711_v0  ;;  %v565_v3 = vld [vmem:[#allocation5 + $0x10] sm:$0xff]   ;;  %v571_v4 = vld [vmem:[#allocation7] sm:$0xff]   ;;  %v566_v5 = vld [vmem:[#allocation5 + $0x18] sm:$0xff]   ;;  %s713_s28 = smov [#allocation10]  }
  0x4b   :  { %514 = vmatprep.subr.bf16.mxu1 %v711_v0  ;;  %530 = vmatprep.mubr.msk.bf16.mxu1 %vm712_vm0, %v711_v0  ;;  %v572_v6 = vld [vmem:[#allocation7 + $0x8] sm:$0xff]   ;;  %v567_v7 = vld [vmem:[#allocation5 + $0x20] sm:$0xff]   ;;  %v573_v8 = vld [vmem:[#allocation7 + $0x10] sm:$0xff]   ;;  %s429_s29 = sshll.u32 %s713_s28, 4  ;;  %s430_s29 = int_to_ptr.vmem [resolvable:$true] %s429_s29 }
  0x4c   :  { %495 = vmatpush3.bf16.msra.mxu0 %v563_v1  ;;  %515 = vmatpush3.bf16.msra.mxu1 %v571_v4  ;;  %v568_v9 = vld [vmem:[#allocation5 + $0x28] sm:$0xff]   ;;  %v574_v10 = vld [vmem:[#allocation7 + $0x18] sm:$0xff]   ;;  %v569_v11 = vld [vmem:[#allocation5 + $0x30] sm:$0xff]   ;;  %p680_p5 = scmp.lt.s32.totalorder %s430_s29, %s430_s29 }
  0x4d   :  { %496 = vmatprep.subr.bf16.mxu0 %v711_v0  ;;  %516 = vmatprep.subr.bf16.mxu1 %v711_v0  ;;  %v575_v12 = vld [vmem:[#allocation7 + $0x20] sm:$0xff]   ;;  %v570_v13 = vld [vmem:[#allocation5 + $0x38] sm:$0xff]   ;;  %v576_v15 = vld [vmem:[#allocation7 + $0x28] sm:$0xff]  }
  0x4e   :  { %v81_v14 = vld [vmem:[#allocation2] sm:$0xff]  ;;  %v577_v17 = vld [vmem:[#allocation7 + $0x30] sm:$0xff]   ;;  %v579_v19 = vld [vmem:[#allocation8] sm:$0xff]  }
  0x4f   :  { %v99_v16 = vpack.c.bf16 %v81_v14, %v81_v14  ;;  %v578_v18 = vld [vmem:[#allocation7 + $0x38] sm:$0xff]   ;;  %v580_v20 = vld [vmem:[#allocation8 + $0x8] sm:$0xff]   ;;  %v581_v21 = vld [vmem:[#allocation8 + $0x10] sm:$0xff]  }
  0x50   :  { %497 = vmatpush3.bf16.msra.mxu0 %v564_v2  ;;  %517 = vmatpush3.bf16.msra.mxu1 %v572_v6  ;;  %v582_v22 = vld [vmem:[#allocation8 + $0x18] sm:$0xff]   ;;  %v583_v23 = vld [vmem:[#allocation8 + $0x20] sm:$0xff]   ;;  %v584_v24 = vld [vmem:[#allocation8 + $0x28] sm:$0xff]  }
  0x51   :  { %498 = vmatprep.subr.bf16.mxu0 %v711_v0  ;;  %518 = vmatprep.subr.bf16.mxu1 %v711_v0  ;;  %v440_v25 = vld [vmem:[%s864_s2] ss:$0 sm:$0xff]  ;;  %v585_v34 = vld [vmem:[#allocation8 + $0x30] sm:$0xff]  }
  0x52   :  { %v586_v35 = vld [vmem:[#allocation8 + $0x38] sm:$0xff]  }
  0x53   :  { %v449_v36 = vld [vmem:[%s866_s4] ss:$0 sm:$0xff]  ;;  %s675_s4 = scalar_lea.vmem %s430_s29, 128 }
  0x54   :  { %499 = vmatpush3.bf16.msra.mxu0 %v565_v3  ;;  %519 = vmatpush3.bf16.msra.mxu1 %v573_v8  ;;  %v458_v45 = vld [vmem:[%s868_s6] ss:$0 sm:$0xff]  ;;  %p676_p4 = scmp.ne.s32.totalorder %s430_s29, %s675_s4  ;;  %p681_p6 = scmp.lt.s32.totalorder %s675_s4, %s675_s4 }
  0x55   :  { %500 = vmatprep.subr.bf16.mxu0 %v711_v0  ;;  %520 = vmatprep.subr.bf16.mxu1 %v711_v0 }
  0x56   :  { %p682_p7 = por %p681_p6, %p680_p5 }
  0x58   :  { %501 = vmatpush3.bf16.msra.mxu0 %v566_v5  ;;  %521 = vmatpush3.bf16.msra.mxu1 %v574_v10  ;;  %p683_p8 = pnand %p682_p7, %p676_p4 }
  0x59   :  { %502 = vmatprep.subr.bf16.mxu0 %v711_v0  ;;  %522 = vmatprep.subr.bf16.mxu1 %v711_v0 }
  0x5c   :  { %503 = vmatpush3.bf16.msra.mxu0 %v567_v7  ;;  %523 = vmatpush3.bf16.msra.mxu1 %v575_v12 }
  0x5d   :  { %504 = vmatprep.subr.bf16.mxu0 %v711_v0  ;;  %524 = vmatprep.subr.bf16.mxu1 %v711_v0 }
  0x60   :  { %505 = vmatpush3.bf16.msra.mxu0 %v568_v9  ;;  %525 = vmatpush3.bf16.msra.mxu1 %v576_v15 }
  0x61   :  { %506 = vmatprep.subr.bf16.mxu0 %v711_v0  ;;  %526 = vmatprep.subr.bf16.mxu1 %v711_v0 }
  0x64   :  { %507 = vmatpush3.bf16.msra.mxu0 %v569_v11  ;;  %527 = vmatpush3.bf16.msra.mxu1 %v577_v17 }
  0x65   :  { %508 = vmatprep.subr.bf16.mxu0 %v711_v0  ;;  %528 = vmatprep.subr.bf16.mxu1 %v711_v0 }
  0x68   :  { %509 = vmatpush3.bf16.msra.mxu0 %v570_v13  ;;  %529 = vmatpush3.bf16.msra.mxu1 %v578_v18 }
  0x69   :  { %534 = vmatprep.subr.bf16.mxu0 %v711_v0 }
  0x6b   :  { %511 = vmatmul.mubr.bf16.vlgmr.msra.gmra.mrb[0].mxu0 %v99_v16 }
  0x6c   :  { %550 = vmatprep.mubr.msk.bf16.mxu0 %vm712_vm0, %v711_v0  ;;  %535 = vmatpush3.bf16.msra.mxu0 %v579_v19 }
  0x6d   :  { %536 = vmatprep.subr.bf16.mxu0 %v711_v0 }
  0x70   :  { %537 = vmatpush3.bf16.msra.mxu0 %v580_v20 }
  0x71   :  { %538 = vmatprep.subr.bf16.mxu0 %v711_v0 }
  0x74   :  { %539 = vmatpush3.bf16.msra.mxu0 %v581_v21 }
  0x75   :  { %540 = vmatprep.subr.bf16.mxu0 %v711_v0 }
  0x78   :  { %541 = vmatpush3.bf16.msra.mxu0 %v582_v22 }
  0x79   :  { %542 = vmatprep.subr.bf16.mxu0 %v711_v0 }
  0x7c   :  { %543 = vmatpush3.bf16.msra.mxu0 %v583_v23 }
  0x7d   :  { %544 = vmatprep.subr.bf16.mxu0 %v711_v0 }
  0x80   :  { %545 = vmatpush3.bf16.msra.mxu0 %v584_v24 }
  0x81   :  { %546 = vmatprep.subr.bf16.mxu0 %v711_v0 }
  0x84   :  { %547 = vmatpush3.bf16.msra.mxu0 %v585_v34 }
  0x85   :  { %548 = vmatprep.subr.bf16.mxu0 %v711_v0 }
  0x88   :  { %549 = vmatpush3.bf16.msra.mxu0 %v586_v35 }
 0x13e   :  { %v188_v26 = vpop.f32.mrb[0].mxu0 }
 0x13f   :  { %v189_v27 = vadd.f32 %v440_v25, %v188_v26  ;;  %v512_v28 = vpop.f32.mrb[1].mxu0 }
 0x140   :  { %v191_v29 = vpop.f32.mrb[2].mxu0 }
 0x141   :  { %v194_v30 = vmul.f32 0.01, %v189_v27  ;;  %v513_v31 = vpop.f32.mrb[3].mxu0 }
 0x143   :  { %v195_v32 = vmax.f32 %v189_v27, %v194_v30 }
 0x145   :  { %v213_v33 = vpack.c.bf16 %v195_v32, %v195_v32 }
 0x147   :  { %531 = vmatmul.mubr.bf16.vlgmr.msra.gmra.mrb[0].mxu1 %v213_v33 }
 0x21a   :  { %v302_v37 = vpop.f32.mrb[0].mxu1 }
 0x21b   :  { %v303_v38 = vadd.f32 %v449_v36, %v302_v37  ;;  %v532_v39 = vpop.f32.mrb[1].mxu1 }
 0x21c   :  { %v305_v40 = vpop.f32.mrb[2].mxu1 }
 0x21d   :  { %v308_v41 = vmul.f32 0.01, %v303_v38  ;;  %v533_v42 = vpop.f32.mrb[3].mxu1 }
 0x21f   :  { %v309_v43 = vmax.f32 %v303_v38, %v308_v41 }
 0x221   :  { %v327_v44 = vpack.c.bf16 %v309_v43, %v309_v43 }
 0x223   :  { %551 = vmatmul.mubr.bf16.vlgmr.msra.gmra.mrb[4].mxu0 %v327_v44 }
 0x2f6   :  { %v416_v46 = vpop.f32.mrb[4].mxu0 }
 0x2f7   :  { %v417_v47 = vadd.f32 %v458_v45, %v416_v46  ;;  %v552_v48 = vpop.f32.mrb[5].mxu0 }
 0x2f8   :  { %v419_v49 = vpop.f32.mrb[6].mxu0 }
 0x2f9   :  { %422 = vst [vmem:[#allocation10] sm:$0xff] %v417_v47  ;;  %v553_v50 = vpop.f32.mrb[7].mxu0 }
 0x2fa   :  { %686 = shalt.err (!%p683_p8)
}
 0x2fb   :  { %s687_s6 = scalar_lea.hbm %s869_s7, 128 }
 0x2fc   :  { %p688_p9 = scmp.ne.s32.totalorder %s869_s7, %s687_s6  ;;  %p691_p10 = scmp.lt.u32.totalorder %s687_s6, %s869_s7 }
 0x2fe   :  { %p693_p11 = pnand %p691_p10, %p688_p9 }
 0x300   :  { %696 = shalt.err (!%p693_p11)
}
 0x301   :  { %432 = dma.vmem_to_hbm [thread:$0]  %s430_s29, 128, %s869_s7, [#allocation4]  }
 0x302   :  { %703 = dma.done.wait [#allocation4], 128  }
 0x303   :  { %704 = vsyncadd [#allocation4], 4294967168 }
 0x304   :  { %436 = vsyncpa [#allocation3], 1 }
 0x305   :  { %437 = vsyncpa [#allocation6], 1 }
 0x306   :  { %438 = vsyncpa [#allocation9], 1 }
 0x307   :  { %439 = vsyncpa [#allocation4], 1 }

// kernel: tpu_custom_call.1
= control target key start
LH: loop header
LB: loop body
LE: loop exit
PB: predicated region body
PF: predicated region fallthrough
CT: control target
= control target key end

     0   :  { %12 = vsyncpa [#allocation3], 0  ;;  %s862_s0 = inlined_call_operand.hbm [shape: f32[8,128], index: 0, kind: input, shape index: {}]   ;;  %s863_s1 = inlined_call_operand.hbm [shape: bf16[128,128], index: 1, kind: input, shape index: {}]   ;;  %s864_s2 = inlined_call_operand.vmem [shape: f32[1,128], index: 2, kind: input, shape index: {}]   ;;  %s865_s3 = inlined_call_operand.hbm [shape: bf16[128,128], index: 3, kind: input, shape index: {}]   ;;  %s866_s4 = inlined_call_operand.vmem [shape: f32[1,128], index: 4, kind: input, shape index: {}]   ;;  %s867_s5 = inlined_call_operand.hbm [shape: bf16[128,128], index: 5, kind: input, shape index: {}]   ;;  %s868_s6 = inlined_call_operand.vmem [shape: f32[1,128], index: 6, kind: input, shape index: {}]   ;;  %s869_s7 = inlined_call_operand.hbm [shape: f32[8,128], index: 7, kind: output, shape index: {}]  }
   0x1   :  { %13 = vsyncpa [#allocation6], 0 }
   0x2   :  { %14 = vsyncpa [#allocation9], 0 }
   0x3   :  { %15 = vsyncpa [#allocation4], 0  ;;  %s705_s24 = smov [#allocation5]   ;;  %s587_s28 = scalar_lea.hbm %s863_s1, 1024 }
   0x4   :  { %s31_s25 = sshll.u32 %s705_s24, 4  ;;  %p588_p0 = scmp.ne.s32.totalorder %s863_s1, %s587_s28  ;;  %s32_s25 = int_to_ptr.vmem [resolvable:$true] %s31_s25 }
   0x5   :  { %p591_p1 = scmp.lt.u32.totalorder %s587_s28, %s863_s1 }
   0x7   :  { %p593_p2 = pnand %p591_p1, %p588_p0 }
   0x9   :  { %596 = shalt.err (!%p593_p2)
}
   0xa   :  { %s597_s10 = scalar_lea.vmem %s32_s25, 1024  ;;  %p602_p4 = scmp.lt.s32.totalorder %s32_s25, %s32_s25 }
   0xb   :  { %p598_p3 = scmp.ne.s32.totalorder %s32_s25, %s597_s10  ;;  %p603_p5 = scmp.lt.s32.totalorder %s597_s10, %s597_s10 }
   0xd   :  { %p604_p6 = por %p603_p5, %p602_p4 }
   0xf   :  { %p605_p7 = pnand %p604_p6, %p598_p3 }
  0x11   :  { %608 = shalt.err (!%p605_p7)
}
  0x12   :  { %s706_s11 = smov 64   ;;  %s707_s12 = smov 4  }
  0x13   :  { %37 = dma.hbm_to_vmem [thread:$0]  %s863_s1, 1024, %s32_s25, [#allocation6], %s706_s11, %s706_s11, %s707_s12  }
  0x14   :  { %s708_s15 = smov [#allocation2]   ;;  %s709_s17 = smov [#allocation7]  }
  0x15   :  { %s22_s16 = sshll.u32 %s708_s15, 4  ;;  %s45_s18 = sshll.u32 %s709_s17, 4  ;;  %s23_s16 = int_to_ptr.vmem [resolvable:$true] %s22_s16  ;;  %s46_s18 = int_to_ptr.vmem [resolvable:$true] %s45_s18 }
  0x16   :  { %s609_s21 = scalar_lea.hbm %s862_s0, 128 }
  0x17   :  { %p610_p8 = scmp.ne.s32.totalorder %s862_s0, %s609_s21  ;;  %p613_p9 = scmp.lt.u32.totalorder %s609_s21, %s862_s0 }
  0x19   :  { %p615_p10 = pnand %p613_p9, %p610_p8 }
  0x1b   :  { %618 = shalt.err (!%p615_p10)
}
  0x1c   :  { %s619_s1 = scalar_lea.vmem %s23_s16, 128  ;;  %p624_p12 = scmp.lt.s32.totalorder %s23_s16, %s23_s16 }
  0x1d   :  { %p620_p11 = scmp.ne.s32.totalorder %s23_s16, %s619_s1  ;;  %p625_p13 = scmp.lt.s32.totalorder %s619_s1, %s619_s1 }
  0x1f   :  { %p626_p0 = por %p625_p13, %p624_p12 }
  0x21   :  { %p627_p1 = pnand %p626_p0, %p620_p11 }
  0x23   :  { %630 = shalt.err (!%p627_p1)
}
  0x24   :  { %25 = dma.hbm_to_vmem [thread:$0]  %s862_s0, 128, %s23_s16, [#allocation3]  }
  0x25   :  { %s631_s30 = scalar_lea.hbm %s865_s3, 1024 }
  0x26   :  { %p632_p2 = scmp.ne.s32.totalorder %s865_s3, %s631_s30  ;;  %p635_p3 = scmp.lt.u32.totalorder %s631_s30, %s865_s3 }
  0x28   :  { %p637_p4 = pnand %p635_p3, %p632_p2 }
  0x2a   :  { %640 = shalt.err (!%p637_p4)
}
  0x2b   :  { %s641_s14 = scalar_lea.vmem %s46_s18, 1024  ;;  %p646_p6 = scmp.lt.s32.totalorder %s46_s18, %s46_s18 }
  0x2c   :  { %p642_p5 = scmp.ne.s32.totalorder %s46_s18, %s641_s14  ;;  %p647_p7 = scmp.lt.s32.totalorder %s641_s14, %s641_s14 }
  0x2e   :  { %p648_p8 = por %p647_p7, %p646_p6 }
  0x30   :  { %p649_p9 = pnand %p648_p8, %p642_p5 }
  0x32   :  { %652 = shalt.err (!%p649_p9)
}
  0x33   :  { %51 = dma.hbm_to_vmem [thread:$0]  %s865_s3, 1024, %s46_s18, [#allocation6], %s706_s11, %s706_s11, %s707_s12  }
  0x34   :  { %s710_s16 = smov [#allocation8]   ;;  %s653_s21 = scalar_lea.hbm %s867_s5, 1024 }
  0x35   :  { %s59_s17 = sshll.u32 %s710_s16, 4  ;;  %p654_p10 = scmp.ne.s32.totalorder %s867_s5, %s653_s21  ;;  %s60_s17 = int_to_ptr.vmem [resolvable:$true] %s59_s17 }
  0x36   :  { %p657_p11 = scmp.lt.u32.totalorder %s653_s21, %s867_s5 }
  0x38   :  { %p659_p12 = pnand %p657_p11, %p654_p10 }
  0x3a   :  { %662 = shalt.err (!%p659_p12)
}
  0x3b   :  { %s663_s1 = scalar_lea.vmem %s60_s17, 1024  ;;  %p668_p0 = scmp.lt.s32.totalorder %s60_s17, %s60_s17 }
  0x3c   :  { %p664_p13 = scmp.ne.s32.totalorder %s60_s17, %s663_s1  ;;  %p669_p1 = scmp.lt.s32.totalorder %s663_s1, %s663_s1 }
  0x3e   :  { %p670_p2 = por %p669_p1, %p668_p0 }
  0x40   :  { %p671_p3 = pnand %p670_p2, %p664_p13 }
  0x42   :  { %674 = shalt.err (!%p671_p3)
}
  0x43   :  { %65 = dma.hbm_to_vmem [thread:$0]  %s867_s5, 1024, %s60_s17, [#allocation9], %s706_s11, %s706_s11, %s707_s12  }
  0x44   :  { %697 = dma.done.wait [#allocation3], 128  }
  0x45   :  { %698 = vsyncadd [#allocation3], 4294967168 }
  0x46   :  { %699 = dma.done.wait [#allocation6], 2048  }
  0x47   :  { %700 = vsyncadd [#allocation6], 4294965248 }
  0x48   :  { %701 = dma.done.wait [#allocation9], 1024  }
  0x49   :  { %702 = vsyncadd [#allocation9], 4294966272  ;;  %v711_v0 = vmov 0.0   ;;  %vm712_vm0 = vmmov 0   ;;  %v563_v1 = vld [vmem:[#allocation5] sm:$0xff]   ;;  %v564_v2 = vld [vmem:[#allocation5 + $0x8] sm:$0xff]  }
  0x4a   :  { %494 = vmatprep.subr.bf16.mxu0 %v711_v0  ;;  %510 = vmatprep.mubr.msk.bf16.mxu0 %vm712_vm0, %v711_v0  ;;  %v565_v3 = vld [vmem:[#allocation5 + $0x10] sm:$0xff]   ;;  %v571_v4 = vld [vmem:[#allocation7] sm:$0xff]   ;;  %v566_v5 = vld [vmem:[#allocation5 + $0x18] sm:$0xff]   ;;  %s713_s28 = smov [#allocation10]  }
  0x4b   :  { %514 = vmatprep.subr.bf16.mxu1 %v711_v0  ;;  %530 = vmatprep.mubr.msk.bf16.mxu1 %vm712_vm0, %v711_v0  ;;  %v572_v6 = vld [vmem:[#allocation7 + $0x8] sm:$0xff]   ;;  %v567_v7 = vld [vmem:[#allocation5 + $0x20] sm:$0xff]   ;;  %v573_v8 = vld [vmem:[#allocation7 + $0x10] sm:$0xff]   ;;  %s429_s29 = sshll.u32 %s713_s28, 4  ;;  %s430_s29 = int_to_ptr.vmem [resolvable:$true] %s429_s29 }
  0x4c   :  { %495 = vmatpush3.bf16.msra.mxu0 %v563_v1  ;;  %515 = vmatpush3.bf16.msra.mxu1 %v571_v4  ;;  %v568_v9 = vld [vmem:[#allocation5 + $0x28] sm:$0xff]   ;;  %v574_v10 = vld [vmem:[#allocation7 + $0x18] sm:$0xff]   ;;  %v569_v11 = vld [vmem:[#allocation5 + $0x30] sm:$0xff]   ;;  %p680_p5 = scmp.lt.s32.totalorder %s430_s29, %s430_s29 }
  0x4d   :  { %496 = vmatprep.subr.bf16.mxu0 %v711_v0  ;;  %516 = vmatprep.subr.bf16.mxu1 %v711_v0  ;;  %v575_v12 = vld [vmem:[#allocation7 + $0x20] sm:$0xff]   ;;  %v570_v13 = vld [vmem:[#allocation5 + $0x38] sm:$0xff]   ;;  %v576_v15 = vld [vmem:[#allocation7 + $0x28] sm:$0xff]  }
  0x4e   :  { %v81_v14 = vld [vmem:[#allocation2] sm:$0xff]  ;;  %v577_v17 = vld [vmem:[#allocation7 + $0x30] sm:$0xff]   ;;  %v579_v19 = vld [vmem:[#allocation8] sm:$0xff]  }
  0x4f   :  { %v99_v16 = vpack.c.bf16 %v81_v14, %v81_v14  ;;  %v578_v18 = vld [vmem:[#allocation7 + $0x38] sm:$0xff]   ;;  %v580_v20 = vld [vmem:[#allocation8 + $0x8] sm:$0xff]   ;;  %v581_v21 = vld [vmem:[#allocation8 + $0x10] sm:$0xff]  }
  0x50   :  { %497 = vmatpush3.bf16.msra.mxu0 %v564_v2  ;;  %517 = vmatpush3.bf16.msra.mxu1 %v572_v6  ;;  %v582_v22 = vld [vmem:[#allocation8 + $0x18] sm:$0xff]   ;;  %v583_v23 = vld [vmem:[#allocation8 + $0x20] sm:$0xff]   ;;  %v584_v24 = vld [vmem:[#allocation8 + $0x28] sm:$0xff]  }
  0x51   :  { %498 = vmatprep.subr.bf16.mxu0 %v711_v0  ;;  %518 = vmatprep.subr.bf16.mxu1 %v711_v0  ;;  %v440_v25 = vld [vmem:[%s864_s2] ss:$0 sm:$0xff]  ;;  %v585_v34 = vld [vmem:[#allocation8 + $0x30] sm:$0xff]  }
  0x52   :  { %v586_v35 = vld [vmem:[#allocation8 + $0x38] sm:$0xff]  }
  0x53   :  { %v449_v36 = vld [vmem:[%s866_s4] ss:$0 sm:$0xff]  ;;  %s675_s4 = scalar_lea.vmem %s430_s29, 128 }
  0x54   :  { %499 = vmatpush3.bf16.msra.mxu0 %v565_v3  ;;  %519 = vmatpush3.bf16.msra.mxu1 %v573_v8  ;;  %v458_v45 = vld [vmem:[%s868_s6] ss:$0 sm:$0xff]  ;;  %p676_p4 = scmp.ne.s32.totalorder %s430_s29, %s675_s4  ;;  %p681_p6 = scmp.lt.s32.totalorder %s675_s4, %s675_s4 }
  0x55   :  { %500 = vmatprep.subr.bf16.mxu0 %v711_v0  ;;  %520 = vmatprep.subr.bf16.mxu1 %v711_v0 }
  0x56   :  { %p682_p7 = por %p681_p6, %p680_p5 }
  0x58   :  { %501 = vmatpush3.bf16.msra.mxu0 %v566_v5  ;;  %521 = vmatpush3.bf16.msra.mxu1 %v574_v10  ;;  %p683_p8 = pnand %p682_p7, %p676_p4 }
  0x59   :  { %502 = vmatprep.subr.bf16.mxu0 %v711_v0  ;;  %522 = vmatprep.subr.bf16.mxu1 %v711_v0 }
  0x5c   :  { %503 = vmatpush3.bf16.msra.mxu0 %v567_v7  ;;  %523 = vmatpush3.bf16.msra.mxu1 %v575_v12 }
  0x5d   :  { %504 = vmatprep.subr.bf16.mxu0 %v711_v0  ;;  %524 = vmatprep.subr.bf16.mxu1 %v711_v0 }
  0x60   :  { %505 = vmatpush3.bf16.msra.mxu0 %v568_v9  ;;  %525 = vmatpush3.bf16.msra.mxu1 %v576_v15 }
  0x61   :  { %506 = vmatprep.subr.bf16.mxu0 %v711_v0  ;;  %526 = vmatprep.subr.bf16.mxu1 %v711_v0 }
  0x64   :  { %507 = vmatpush3.bf16.msra.mxu0 %v569_v11  ;;  %527 = vmatpush3.bf16.msra.mxu1 %v577_v17 }
  0x65   :  { %508 = vmatprep.subr.bf16.mxu0 %v711_v0  ;;  %528 = vmatprep.subr.bf16.mxu1 %v711_v0 }
  0x68   :  { %509 = vmatpush3.bf16.msra.mxu0 %v570_v13  ;;  %529 = vmatpush3.bf16.msra.mxu1 %v578_v18 }
  0x69   :  { %534 = vmatprep.subr.bf16.mxu0 %v711_v0 }
  0x6b   :  { %511 = vmatmul.mubr.bf16.vlgmr.msra.gmra.mrb[0].mxu0 %v99_v16 }
  0x6c   :  { %550 = vmatprep.mubr.msk.bf16.mxu0 %vm712_vm0, %v711_v0  ;;  %535 = vmatpush3.bf16.msra.mxu0 %v579_v19 }
  0x6d   :  { %536 = vmatprep.subr.bf16.mxu0 %v711_v0 }
  0x70   :  { %537 = vmatpush3.bf16.msra.mxu0 %v580_v20 }
  0x71   :  { %538 = vmatprep.subr.bf16.mxu0 %v711_v0 }
  0x74   :  { %539 = vmatpush3.bf16.msra.mxu0 %v581_v21 }
  0x75   :  { %540 = vmatprep.subr.bf16.mxu0 %v711_v0 }
  0x78   :  { %541 = vmatpush3.bf16.msra.mxu0 %v582_v22 }
  0x79   :  { %542 = vmatprep.subr.bf16.mxu0 %v711_v0 }
  0x7c   :  { %543 = vmatpush3.bf16.msra.mxu0 %v583_v23 }
  0x7d   :  { %544 = vmatprep.subr.bf16.mxu0 %v711_v0 }
  0x80   :  { %545 = vmatpush3.bf16.msra.mxu0 %v584_v24 }
  0x81   :  { %546 = vmatprep.subr.bf16.mxu0 %v711_v0 }
  0x84   :  { %547 = vmatpush3.bf16.msra.mxu0 %v585_v34 }
  0x85   :  { %548 = vmatprep.subr.bf16.mxu0 %v711_v0 }
  0x88   :  { %549 = vmatpush3.bf16.msra.mxu0 %v586_v35 }
 0x13e   :  { %v188_v26 = vpop.f32.mrb[0].mxu0 }
 0x13f   :  { %v189_v27 = vadd.f32 %v440_v25, %v188_v26  ;;  %v512_v28 = vpop.f32.mrb[1].mxu0 }
 0x140   :  { %v191_v29 = vpop.f32.mrb[2].mxu0 }
 0x141   :  { %v194_v30 = vmul.f32 0.01, %v189_v27  ;;  %v513_v31 = vpop.f32.mrb[3].mxu0 }
 0x143   :  { %v195_v32 = vmax.f32 %v189_v27, %v194_v30 }
 0x145   :  { %v213_v33 = vpack.c.bf16 %v195_v32, %v195_v32 }
 0x147   :  { %531 = vmatmul.mubr.bf16.vlgmr.msra.gmra.mrb[0].mxu1 %v213_v33 }
 0x21a   :  { %v302_v37 = vpop.f32.mrb[0].mxu1 }
 0x21b   :  { %v303_v38 = vadd.f32 %v449_v36, %v302_v37  ;;  %v532_v39 = vpop.f32.mrb[1].mxu1 }
 0x21c   :  { %v305_v40 = vpop.f32.mrb[2].mxu1 }
 0x21d   :  { %v308_v41 = vmul.f32 0.01, %v303_v38  ;;  %v533_v42 = vpop.f32.mrb[3].mxu1 }
 0x21f   :  { %v309_v43 = vmax.f32 %v303_v38, %v308_v41 }
 0x221   :  { %v327_v44 = vpack.c.bf16 %v309_v43, %v309_v43 }
 0x223   :  { %551 = vmatmul.mubr.bf16.vlgmr.msra.gmra.mrb[4].mxu0 %v327_v44 }
 0x2f6   :  { %v416_v46 = vpop.f32.mrb[4].mxu0 }
 0x2f7   :  { %v417_v47 = vadd.f32 %v458_v45, %v416_v46  ;;  %v552_v48 = vpop.f32.mrb[5].mxu0 }
 0x2f8   :  { %v419_v49 = vpop.f32.mrb[6].mxu0 }
 0x2f9   :  { %422 = vst [vmem:[#allocation10] sm:$0xff] %v417_v47  ;;  %v553_v50 = vpop.f32.mrb[7].mxu0 }
 0x2fa   :  { %686 = shalt.err (!%p683_p8)
}
 0x2fb   :  { %s687_s6 = scalar_lea.hbm %s869_s7, 128 }
 0x2fc   :  { %p688_p9 = scmp.ne.s32.totalorder %s869_s7, %s687_s6  ;;  %p691_p10 = scmp.lt.u32.totalorder %s687_s6, %s869_s7 }
 0x2fe   :  { %p693_p11 = pnand %p691_p10, %p688_p9 }
 0x300   :  { %696 = shalt.err (!%p693_p11)
}
 0x301   :  { %432 = dma.vmem_to_hbm [thread:$0]  %s430_s29, 128, %s869_s7, [#allocation4]  }
 0x302   :  { %703 = dma.done.wait [#allocation4], 128  }
 0x303   :  { %704 = vsyncadd [#allocation4], 4294967168 }
 0x304   :  { %436 = vsyncpa [#allocation3], 1 }
 0x305   :  { %437 = vsyncpa [#allocation6], 1 }
 0x306   :  { %438 = vsyncpa [#allocation9], 1 }
 0x307   :  { %439 = vsyncpa [#allocation4], 1 }

</bundles_post_ra>
